<compile_context>
chip_gen: v6e
topology: v6e:2x2x1
jax: 0.10.0
libtpu: 0.0.40
codegen_flags: <defaults>
</compile_context>

<pallas_src>
import numpy as np
import jax
import jax.numpy as jnp
from jax.experimental import pallas as pl
from jax.experimental.pallas import tpu as pltpu


# -----------------------------------------------------------------------------
# Kernel 1: conv-as-matmul (+ bias + ReLU) for the extractor backbone
# -----------------------------------------------------------------------------
_CONV_TM = 256  # M tile (rows of the im2col matrix); multiple of 8, VMEM-friendly.


def _conv_mm_kernel(a_ref, w_ref, b_ref, o_ref):
    acc = jnp.dot(a_ref[...], w_ref[...], preferred_element_type=jnp.float32)
    acc = acc + b_ref[...]                    # (1, Npad) broadcast over rows
    o_ref[...] = jnp.maximum(acc, 0.0)


def _conv_matmul(a, w_mat, b_mat):
    """a: (M, K) f32, w_mat: (K, Npad) f32, b_mat: (1, Npad) f32 -> (M, Npad) f32."""
    M, K = a.shape
    _, N = w_mat.shape
    tm = min(_CONV_TM, M)
    # Pad M up to a multiple of the tile so every block is (tm, K) with tm % 8 == 0.
    Mp = -(-M // tm) * tm
    if Mp != M:
        a = jnp.pad(a, ((0, Mp - M), (0, 0)))
    out = pl.pallas_call(
        _conv_mm_kernel,
        out_shape=jax.ShapeDtypeStruct((Mp, N), jnp.float32),
        grid=(Mp // tm,),
        in_specs=[
            pl.BlockSpec((tm, K), lambda i: (i, 0)),   # A tile walks M
            pl.BlockSpec((K, N), lambda i: (0, 0)),    # weights resident
            pl.BlockSpec((1, N), lambda i: (0, 0)),    # bias resident
        ],
        out_specs=pl.BlockSpec((tm, N), lambda i: (i, 0)),
        compiler_params=pltpu.CompilerParams(
            dimension_semantics=("parallel",)),        # megacore-shardable on v7x
    )(a, w_mat, b_mat)
    return out[:M] if Mp != M else out


def extractor(x_nchw, conv_w, conv_b):
    """3x3 conv (stride 1, pad 1) + ReLU.

    Returns (NHWC feature map with channels zero-padded to a multiple of 128, Cout).
    """
    B, Cin, H, W = x_nchw.shape
    Cout = conv_w.shape[0]
    Npad = -(-Cout // 128) * 128                              # lane-dense output width

    x = jnp.transpose(x_nchw, (0, 2, 3, 1))                   # NHWC
    xp = jnp.pad(x, ((0, 0), (1, 1), (1, 1), (0, 0)))
    # TODO(synk): fuse im2col into the matmul kernel (walk shifted windows of the
    # padded input per tap, accumulating in VMEM) to avoid the ~9x HBM blow-up below.
    cols = [xp[:, kh:kh + H, kw:kw + W, :] for kh in range(3) for kw in range(3)]
    a = jnp.concatenate(cols, axis=-1).reshape(B * H * W, 9 * Cin)

    # (Cout, Cin, KH, KW) -> (KH, KW, Cin, Cout) to match im2col column order,
    # then zero-pad Cout -> Npad so the matmul output is lane-dense.
    w_mat = jnp.transpose(conv_w, (2, 3, 1, 0)).reshape(9 * Cin, Cout)
    w_mat = jnp.pad(w_mat, ((0, 0), (0, Npad - Cout)))
    b_mat = jnp.pad(conv_b, (0, Npad - Cout)).reshape(1, Npad)

    out = _conv_matmul(a, w_mat, b_mat)
    return out.reshape(B, H, W, Npad), Cout


# -----------------------------------------------------------------------------
# Kernel 2: RoI max-pool (legacy torchvision RoIPool semantics, spatial_scale = 1.0)
# -----------------------------------------------------------------------------
def _make_roi_maxpool_kernel(PH, PW):
    def kernel(bidx_ref, ys_ref, ye_ref, xs_ref, xe_ref, feat_ref, out_ref):
        del bidx_ref  # only used by the index_map
        r = pl.program_id(0)
        _, H, W, C = feat_ref.shape
        feat = feat_ref[0]                                    # (H, W, C)
        neg_inf = jnp.float32(-jnp.inf)

        w_iota = jax.lax.broadcasted_iota(jnp.int32, (1, W, 1), 1)
        h_iota = jax.lax.broadcasted_iota(jnp.int32, (H, 1), 0)

        # Stage 1 (hoisted out of the bin loop): per-px column-masked max over W.
        # PW full-map passes instead of PH*PW, and no reshape copies.
        wmaxes = []
        for px in range(PW):
            xs_v = xs_ref[r * PW + px]
            xe_v = xe_ref[r * PW + px]
            cmask = (w_iota >= xs_v) & (w_iota < xe_v)        # (1, W, 1)
            wmaxes.append(jnp.max(jnp.where(cmask, feat, neg_inf), axis=1))  # (H, C)

        # Stage 2: per-(py, px) row-masked max over H (cheap: (H, C) work per bin).
        rows = []
        for py in range(PH):
            ys_v = ys_ref[r * PH + py]
            ye_v = ye_ref[r * PH + py]
            rmask = (h_iota >= ys_v) & (h_iota < ye_v)        # (H, 1)
            for px in range(PW):
                xs_v = xs_ref[r * PW + px]
                xe_v = xe_ref[r * PW + px]
                pooled = jnp.max(jnp.where(rmask, wmaxes[px], neg_inf),
                                 axis=0, keepdims=True)       # (1, C)
                empty = jnp.logical_or(ye_v <= ys_v, xe_v <= xs_v)
                rows.append(jnp.where(empty, jnp.float32(0.0), pooled))
        out_ref[0] = jnp.concatenate(rows, axis=0)            # (PH*PW, C) lane-dense
    return kernel


def _roi_bins(rois_np, pooled_h, pooled_w, height, width, spatial_scale=1.0):
    """Integer bin boundaries, legacy torchvision RoIPool convention (x2-x1+1, round).

    rois: [y1, x1, y2, x2].
    """
    R = rois_np.shape[0]
    ys = np.zeros((R, pooled_h), np.int32)
    ye = np.zeros((R, pooled_h), np.int32)
    xs = np.zeros((R, pooled_w), np.int32)
    xe = np.zeros((R, pooled_w), np.int32)
    for i in range(R):
        y1, x1, y2, x2 = rois_np[i]
        rsh = int(round(float(y1) * spatial_scale))
        rsw = int(round(float(x1) * spatial_scale))
        reh = int(round(float(y2) * spatial_scale))
        rew = int(round(float(x2) * spatial_scale))
        roi_h = max(reh - rsh + 1, 1)
        roi_w = max(rew - rsw + 1, 1)
        bin_h = roi_h / pooled_h
        bin_w = roi_w / pooled_w
        for ph in range(pooled_h):
            hs = int(np.floor(ph * bin_h)) + rsh
            he = int(np.ceil((ph + 1) * bin_h)) + rsh
            ys[i, ph] = min(max(hs, 0), height)
            ye[i, ph] = min(max(he, 0), height)
        for pw in range(pooled_w):
            ws = int(np.floor(pw * bin_w)) + rsw
            we = int(np.ceil((pw + 1) * bin_w)) + rsw
            xs[i, pw] = min(max(ws, 0), width)
            xe[i, pw] = min(max(we, 0), width)
    return ys.reshape(-1), ye.reshape(-1), xs.reshape(-1), xe.reshape(-1)


def extractor_roi(h_nhwc, rois_np, roi_indices_np, cout, pooled=2):
    """h_nhwc: (B, H, W, Cpad) channel-padded feature map. Returns (R, cout, P, P)."""
    B, H, W, Cp = h_nhwc.shape
    R = rois_np.shape[0]
    ys, ye, xs, xe = _roi_bins(rois_np, pooled, pooled, H, W, spatial_scale=1.0)

    bidx = jnp.asarray(roi_indices_np, jnp.int32)
    ys = jnp.asarray(ys); ye = jnp.asarray(ye)
    xs = jnp.asarray(xs); xe = jnp.asarray(xe)

    # ROIs are grouped by batch index (host loop emits them grouped), so consecutive
    # grid steps map to the same feature block and the HBM->VMEM DMA is skipped.
    # TODO(synk): for very large feature maps on v7x (64 MiB VMEM), switch the feature
    # input to memory_space=pl.ANY + manual row-band DMA from the SMEM bin bounds.
    grid_spec = pltpu.PrefetchScalarGridSpec(
        num_scalar_prefetch=5,
        grid=(R,),
        in_specs=[
            pl.BlockSpec((1, H, W, Cp),
                         lambda r, bidx, ys, ye, xs, xe: (bidx[r], 0, 0, 0)),
        ],
        out_specs=pl.BlockSpec((1, pooled * pooled, Cp),
                               lambda r, bidx, ys, ye, xs, xe: (r, 0, 0)),
    )
    f = pl.pallas_call(
        _make_roi_maxpool_kernel(pooled, pooled),
        out_shape=jax.ShapeDtypeStruct((R, pooled * pooled, Cp), jnp.float32),
        grid_spec=grid_spec,
        compiler_params=pltpu.CompilerParams(
            dimension_semantics=("arbitrary",)),
    )(bidx, ys, ye, xs, xe, h_nhwc)

    # Drop channel padding, then back to PyTorch convention: (R, C, P, P).
    f = f[:, :, :cout].reshape(R, pooled, pooled, cout)
    return jnp.transpose(f, (0, 3, 1, 2))


# -----------------------------------------------------------------------------
# FasterRCNN forward (host-side roi list building mirrors the PyTorch code)
# -----------------------------------------------------------------------------
def faster_rcnn_forward(x_nchw, bboxes, conv_w, conv_b, pooled=2):
    _, _, H, W = x_nchw.shape
    h, cout = extractor(x_nchw, conv_w, conv_b)               # NHWC (channel-padded)

    # One host transfer for all boxes (mirrors .cpu().numpy() in the PyTorch code,
    # but avoids a per-image device sync).
    bboxes_np = np.asarray(jax.device_get(bboxes), dtype=np.float32)

    rois = []
    roi_indices = []
    for n in range(x_nchw.shape[0]):
        bbox = bboxes_np[n].copy()
        bbox[:, 0::2] = np.clip(bbox[:, 0::2], 0, H)
        bbox[:, 1::2] = np.clip(bbox[:, 1::2], 0, W)
        rois.extend(bbox.tolist())
        roi_indices.extend((n * np.ones(bbox.shape[0])).tolist())
    rois = np.asarray(rois, dtype=np.float32)
    roi_indices = np.asarray(roi_indices, dtype=np.int32)     # grouped by batch index

    f = extractor_roi(h, rois, roi_indices, cout, pooled=pooled)
    return f


def resize_bbox(bbox, in_size, out_size):
    bbox = np.array(bbox, dtype=np.float32)
    y_scale = float(out_size[0]) / in_size[0]
    x_scale = float(out_size[1]) / in_size[1]
    bbox[:, 0] = y_scale * bbox[:, 0]
    bbox[:, 2] = y_scale * bbox[:, 2]
    bbox[:, 1] = x_scale * bbox[:, 1]
    bbox[:, 3] = x_scale * bbox[:, 3]
    return bbox


if __name__ == "__main__":
    B, Cin, H, W = 2, 4, 16, 16
    Cout = 8
    R_PER_IMG = 3
    POOL = 2

    key = jax.random.PRNGKey(0)
    kx, kb, kw, kbias = jax.random.split(key, 4)

    x = jax.random.normal(kx, (B, Cin, H, W), jnp.float32)

    # random boxes (some coords outside [0, H]/[0, W] to exercise the clipping path)
    raw = jax.random.uniform(kb, (B, R_PER_IMG, 2, 2),
                             minval=-2.0, maxval=18.0, dtype=jnp.float32)
    lo = jnp.min(raw, axis=-1)
    hi = jnp.max(raw, axis=-1) + 1.0
    # bbox format: [y1, x1, y2, x2]
    bboxes = jnp.stack([lo[..., 0], lo[..., 1], hi[..., 0], hi[..., 1]], axis=-1)

    # deterministic synthetic extractor parameters (Conv2d(Cin, Cout, 3, padding=1))
    conv_w = 0.1 * jax.random.normal(kw, (Cout, Cin, 3, 3), jnp.float32)
    conv_b = 0.05 * jax.random.normal(kbias, (Cout,), jnp.float32)

    f = faster_rcnn_forward(x, bboxes, conv_w, conv_b, pooled=POOL)
    f = jax.block_until_ready(f)

    assert f.shape == (B * R_PER_IMG, Cout, POOL, POOL), f.shape
    assert bool(jnp.all(jnp.isfinite(f)))
    print("KERNEL_OK")
</pallas_src>

<mosaic_0001>
module attributes {stable_mosaic.version = 11 : i64} {
  func.func @_conv_mm_kernel(%arg0: i32, %arg1: memref<256x36xf32, #tpu.memory_space<vmem>>, %arg2: memref<36x128xf32, #tpu.memory_space<vmem>>, %arg3: memref<1x128xf32, #tpu.memory_space<vmem>>, %arg4: memref<256x128xf32, #tpu.memory_space<vmem>>) attributes {dimension_semantics = [#tpu.dimension_semantics<parallel>], iteration_bounds = array<i64: 2>, scalar_prefetch = 0 : i64, scratch_operands = 0 : i64, tpu.core_type = #tpu.core_type<tc>, window_params = [{transform_indices = @transform_0, window_bounds = array<i64: 256, 36>}, {pipeline_mode = #tpu.pipeline_mode<synchronous>, transform_indices = @transform_1, window_bounds = array<i64: 36, 128>}, {pipeline_mode = #tpu.pipeline_mode<synchronous>, transform_indices = @transform_2, window_bounds = array<i64: 1, 128>}, {transform_indices = @transform_3, window_bounds = array<i64: 256, 128>}]} {
    %c0 = arith.constant 0 : index
    %c0_0 = arith.constant 0 : index
    %0 = vector.load %arg1[%c0, %c0_0] : memref<256x36xf32, #tpu.memory_space<vmem>>, vector<256x36xf32>
    %c0_1 = arith.constant 0 : index
    %c0_2 = arith.constant 0 : index
    %1 = vector.load %arg2[%c0_1, %c0_2] : memref<36x128xf32, #tpu.memory_space<vmem>>, vector<36x128xf32>
    %cst = arith.constant dense<0.000000e+00> : vector<256x128xf32>
    %2 = tpu.matmul %0, %1, %cst {dimension_numbers = #tpu.dot_dimension_numbers<[1], [0], [0], [1], [0, 0, 1, 1], [], []>} : vector<256x36xf32>, vector<36x128xf32>, vector<256x128xf32> -> vector<256x128xf32>
    %c0_3 = arith.constant 0 : index
    %c0_4 = arith.constant 0 : index
    %3 = vector.load %arg3[%c0_3, %c0_4] : memref<1x128xf32, #tpu.memory_space<vmem>>, vector<1x128xf32>
    %4 = vector.broadcast %3 : vector<1x128xf32> to vector<256x128xf32>
    %5 = arith.addf %2, %4 : vector<256x128xf32>
    %cst_5 = arith.constant 0.000000e+00 : f32
    %6 = vector.broadcast %cst_5 : f32 to vector<256x128xf32>
    %7 = arith.maximumf %5, %6 : vector<256x128xf32>
    %c0_6 = arith.constant 0 : index
    %c0_7 = arith.constant 0 : index
    %8 = vector.load %arg4[%c0_6, %c0_7] : memref<256x128xf32, #tpu.memory_space<vmem>>, vector<256x128xf32>
    tpu.vector_store %arg4[%c0_6, %c0_7], %7 {strides = array<i32>} : memref<256x128xf32, #tpu.memory_space<vmem>>, vector<256x128xf32>,
    return
  }
  func.func @transform_0(%arg0: i32) -> (i32, i32) {
    %c0_i32 = arith.constant 0 : i32
    %c0_i32_0 = arith.constant 0 : i32
    return %arg0, %c0_i32 : i32, i32
  }
  func.func @transform_1(%arg0: i32) -> (i32, i32) {
    %c0_i32 = arith.constant 0 : i32
    %c0_i32_0 = arith.constant 0 : i32
    %c0_i32_1 = arith.constant 0 : i32
    return %c0_i32, %c0_i32_0 : i32, i32
  }
  func.func @transform_2(%arg0: i32) -> (i32, i32) {
    %c0_i32 = arith.constant 0 : i32
    %c0_i32_0 = arith.constant 0 : i32
    %c0_i32_1 = arith.constant 0 : i32
    return %c0_i32, %c0_i32_0 : i32, i32
  }
  func.func @transform_3(%arg0: i32) -> (i32, i32) {
    %c0_i32 = arith.constant 0 : i32
    %c0_i32_0 = arith.constant 0 : i32
    return %arg0, %c0_i32 : i32, i32
  }
}

</mosaic_0001>

<bundles_post_ra>
// kernel: tpu_custom_call.1
= control target key start
LH: loop header
LB: loop body
LE: loop exit
PB: predicated region body
PF: predicated region fallthrough
CT: control target
= control target key end

     0   :  { %8 = vsyncpa [#allocation3], 0  ;;  %s1218_s0 = inlined_call_operand.vmem [shape: f32[512,36], index: 0, kind: input, shape index: {}]   ;;  %s1219_s1 = inlined_call_operand.vmem [shape: f32[36,128], index: 1, kind: input, shape index: {}]   ;;  %s1220_s2 = inlined_call_operand.vmem [shape: f32[1,128], index: 2, kind: input, shape index: {}]   ;;  %s1221_s3 = inlined_call_operand.hbm [shape: f32[512,128], index: 3, kind: output, shape index: {}]  }
   0x1   :  { %10 = vsyncpa [#allocation3 + $0x1], 0  ;;  %s960_s12 = smov 0   ;;  %s962_s13 = smov 0  }
   0x2   :  { %s964_s14 = smov 0   ;;  %s966_s15 = smov 0  }
   0x3 LB: > { %s981_s16 = sadd.s32 4294967295, %s935_s15   ;;  %s682_s17 = sadd.s32 4294967294, %s935_s15   ;;  %s935_s15 = sphi %s966_s15, %s1227_s15   ;;  %s931_s14 = sphi %s964_s14, %s1226_s14   ;;  %s927_s13 = sphi %s962_s13, %s1225_s13   ;;  %s923_s12 = sphi %s960_s12, %s1224_s12  }
   0x4   : > { %s985_s18 = sadd.s32 1, %s935_s15   ;;  %s91_s19 = sadd.s32 1, %s931_s14 }
   0x5   : > { %s88_s20 = ssub.s32 %s935_s15, %s985_s18  ;;  %p101_p0 = scmp.ne.s32.totalorder %s931_s14, %s927_s13 }
   0x6   : > { %p89_p1 = scmp.eq.s32.totalorder %s88_s20, 0  ;;  %p102_p2 = scmp.eq.s32.totalorder %s981_s16, 1 }
   0x7   : > { %p107_p3 = scmp.ne.s32.totalorder %s927_s13, %s923_s12  ;;  %p108_p4 = scmp.eq.s32.totalorder %s682_s17, 1 }
   0x8   : > { %s996_s21 = scalar_select %p89_p1, %s931_s14, %s91_s19  }
   0x9   : > { %p998_p5 = por %p102_p2, %p101_p0  ;;  %p1002_p6 = por %p108_p4, %p107_p3 }
   0xa   : > { %p685_p7 = scmp.ge.s32.totalorder %s935_s15, 1  ;;  %p141_p8 = scmp.lt.s32.totalorder %s935_s15, 3 }
   0xc   : > { %p142_p9 = pnand %p685_p7, %p141_p8 }
   0xd   : > { %s687_s28 = sshll.u32 (!%p142_p9), %s981_s16, 5  ;;  %s162_s17 = sand.u32 (!%p142_p9), 1, %s927_s13  }
   0xe   : > { %145 = sbr.rel (%p142_p9) target bundleno = 272 (0x110), region = 32  ;;  %p166_p10 = scmp.lt.s32.totalorder (!%p142_p9), %s687_s28, 63 }
   0xf   : > { %s686_s24 = sshll.u32 (!%p142_p9), %s162_s17, 8  ;;  %s728_s26 = sshll.u32 (!%p142_p9), %s981_s16, 12 }
  0x10   : > { %s1105_s25 = scalar_lea.vmem (!%p142_p9), [#allocation2], %s686_s24  ;;  %s1168_s30 = scalar_lea.hbm (!%p142_p9), %s1221_s3, %s728_s26 }
  0x11   : > { %s620_s27 = sshll.u32 (!%p142_p9), %s1105_s25, 4  ;;  %s1178_s16 = scalar_lea.sflag (!%p142_p9), [#allocation3], %s162_s17  ;;  %s1170_s27 = int_to_ptr.vmem [resolvable:$true] %s620_s27 }
  0x12   : > { %s875_s4 = scalar_lea.vmem (!%p142_p9), %s1170_s27, 4096  ;;  %s937_s5 = smov (!%p142_p9), [#allocation2]  }
  0x13   : > { %v208_v0 = vld [vmem:[%s1219_s1 + $0x20] sm:$0xf]  ;;  %vm313_vm0 = vcmask 1043456   ;;  %v207_v1 = vld [vmem:[%s1219_s1 + $0x18] sm:$0xff]  ;;  %v206_v2 = vld [vmem:[%s1219_s1 + $0x10] sm:$0xff]  ;;  %s1229_s28 = smov (!%p166_p10, %s687_s28), 63  ;;  %p876_p11 = scmp.ne.s32.totalorder %s1170_s27, %s875_s4 }
  0x14   : > { %766 = vmatprep.subr.msk.mxu0 %vm313_vm0, %v208_v0  ;;  %824 = vmatprep.subr.msk.mxu1 %vm313_vm0, %v208_v0  ;;  %v205_v3 = vld [vmem:[%s1219_s1 + $0x8] sm:$0xff]  ;;  %s688_s6 = sshll.u32 %s1229_s28, 3  ;;  %v204_v4 = vld [vmem:[%s1219_s1] sm:$0xff]  ;;  %vm216_vm1 = vcmask 293888  }
  0x15   : > { %767 = vmatpush3.msk.msra.mxu0 %vm313_vm0, %v208_v0  ;;  %829 = vmatpush3.msk.msra.mxu1 %vm313_vm0, %v208_v0  ;;  %s1027_s11 = scalar_lea.vmem %s1218_s0, %s688_s6  ;;  %v1097_v37 = vld [vmem:[%s1220_s2] ss:$0 sm:$0xff]  ;;  %p877_p12 = pnand %p876_p11, %p998_p5 }
  0x16   : > { %768 = vmatprep.subr.mxu0 %v207_v1  ;;  %825 = vmatprep.subr.mxu1 %v207_v1  ;;  %v172_v5 = vld [vmem:[%s1027_s11] sm:$0xff]  ;;  %v173_v7 = vld [vmem:[%s1027_s11 + $0x8] sm:$0xff]  ;;  %v174_v9 = vld [vmem:[%s1027_s11 + $0x10] sm:$0xff]  ;;  %s879_s6 = sshll.u32 %s937_s5, 4  ;;  %s880_s6 = int_to_ptr.vmem [resolvable:$false] %s879_s6 }
  0x17   : > { %769 = vmatpush3.msra.mxu0 %v207_v1  ;;  %830 = vmatpush3.msra.mxu1 %v207_v1  ;;  %v188_v6 = vld [vmem:[%s1027_s11 + $0x80] sm:$0xff]  ;;  %v189_v8 = vld [vmem:[%s1027_s11 + $0x88] sm:$0xff]  ;;  %v190_v10 = vld [vmem:[%s1027_s11 + $0x90] sm:$0xff]  ;;  %p878_p13 = pneg %p877_p12  ;;  %s881_s7 = scalar_lea.vmem %s880_s6, 8192 }
  0x18   : > { %770 = vmatprep.subr.mxu0 %v206_v2  ;;  %826 = vmatprep.subr.mxu1 %v206_v2  ;;  %v175_v11 = vld [vmem:[%s1027_s11 + $0x18] sm:$0xff]  ;;  %v176_v13 = vld [vmem:[%s1027_s11 + $0x20] sm:$0xff]  ;;  %v177_v15 = vld [vmem:[%s1027_s11 + $0x28] sm:$0xff]  ;;  %p882_p0 = scmp.lt.s32.totalorder %s1170_s27, %s880_s6  ;;  %p883_p1 = scmp.lt.s32.totalorder %s881_s7, %s875_s4 }
  0x19   : > { %771 = vmatpush3.msra.mxu0 %v206_v2  ;;  %831 = vmatpush3.msra.mxu1 %v206_v2  ;;  %v191_v12 = vld [vmem:[%s1027_s11 + $0x98] sm:$0xff]  ;;  %v192_v14 = vld [vmem:[%s1027_s11 + $0xa0] sm:$0xff]  ;;  %v193_v16 = vld [vmem:[%s1027_s11 + $0xa8] sm:$0xff] }
  0x1a   : > { %772 = vmatprep.subr.mxu0 %v205_v3  ;;  %827 = vmatprep.subr.mxu1 %v205_v3  ;;  %v178_v17 = vld [vmem:[%s1027_s11 + $0x30] sm:$0xff]  ;;  %v179_v19 = vld [vmem:[%s1027_s11 + $0x38] sm:$0xff]  ;;  %v180_v21 = vld [vmem:[%s1027_s11 + $0x40] sm:$0xff]  ;;  %p884_p2 = por %p883_p1, %p882_p0 }
  0x1b   : > { %773 = vmatpush3.msra.mxu0 %v205_v3  ;;  %832 = vmatpush3.msra.mxu1 %v205_v3  ;;  %v194_v18 = vld [vmem:[%s1027_s11 + $0xb0] sm:$0xff]  ;;  %v195_v20 = vld [vmem:[%s1027_s11 + $0xb8] sm:$0xff]  ;;  %v196_v22 = vld [vmem:[%s1027_s11 + $0xc0] sm:$0xff] }
  0x1c   : > { %774 = vmatprep.subr.mxu0 %v204_v4  ;;  %828 = vmatprep.subr.mxu1 %v204_v4  ;;  %v181_v23 = vld [vmem:[%s1027_s11 + $0x48] sm:$0xff]  ;;  %v182_v25 = vld [vmem:[%s1027_s11 + $0x50] sm:$0xff]  ;;  %v183_v27 = vld [vmem:[%s1027_s11 + $0x58] sm:$0xff]  ;;  %p885_p3 = pnand %p884_p2, %p878_p13 }
  0x1d   : > { %775 = vmatpush3.msra.mxu0 %v204_v4  ;;  %833 = vmatpush3.msra.mxu1 %v204_v4  ;;  %v197_v24 = vld [vmem:[%s1027_s11 + $0xc8] sm:$0xff]  ;;  %v198_v26 = vld [vmem:[%s1027_s11 + $0xd0] sm:$0xff]  ;;  %v199_v28 = vld [vmem:[%s1027_s11 + $0xd8] sm:$0xff] }
  0x1e   : > { %776 = vmatprep.mubr.msk.f32.mxu0 %vm216_vm1, %v172_v5  ;;  %800 = vmatprep.mubr.msk.f32.mxu1 %vm216_vm1, %v188_v6  ;;  %v184_v29 = vld [vmem:[%s1027_s11 + $0x60] sm:$0xff]  ;;  %v185_v31 = vld [vmem:[%s1027_s11 + $0x68] sm:$0xff]  ;;  %v186_v33 = vld [vmem:[%s1027_s11 + $0x70] sm:$0xff] }
  0x1f   : > { %777 = vmatmul.mubr.msk.f32.vlgmr.msra.gmra.mxu0 %vm216_vm1, %v173_v7  ;;  %801 = vmatmul.mubr.msk.f32.vlgmr.msra.gmra.mxu1 %vm216_vm1, %v189_v8  ;;  %v200_v30 = vld [vmem:[%s1027_s11 + $0xe0] sm:$0xff]  ;;  %v201_v32 = vld [vmem:[%s1027_s11 + $0xe8] sm:$0xff]  ;;  %v202_v34 = vld [vmem:[%s1027_s11 + $0xf0] sm:$0xff] }
  0x20   : > { %779 = vmatprep.mubr.msk.f32.mxu0 %vm216_vm1, %v174_v9  ;;  %803 = vmatprep.mubr.msk.f32.mxu1 %vm216_vm1, %v190_v10  ;;  %v187_v35 = vld [vmem:[%s1027_s11 + $0x78] sm:$0xff] }
  0x21   : > { %v203_v36 = vld [vmem:[%s1027_s11 + $0xf8] sm:$0xff] }
  0x23   : > { %780 = vmatmul.mubr.msk.f32.gmra.mxu0 %vm216_vm1, %v175_v11  ;;  %804 = vmatmul.mubr.msk.f32.gmra.mxu1 %vm216_vm1, %v191_v12 }
  0x24   : > { %782 = vmatprep.mubr.msk.f32.mxu0 %vm216_vm1, %v176_v13  ;;  %806 = vmatprep.mubr.msk.f32.mxu1 %vm216_vm1, %v192_v14 }
  0x27   : > { %783 = vmatmul.mubr.msk.f32.gmra.mxu0 %vm216_vm1, %v177_v15  ;;  %807 = vmatmul.mubr.msk.f32.gmra.mxu1 %vm216_vm1, %v193_v16 }
  0x28   : > { %785 = vmatprep.mubr.msk.f32.mxu0 %vm216_vm1, %v178_v17  ;;  %809 = vmatprep.mubr.msk.f32.mxu1 %vm216_vm1, %v194_v18 }
  0x2b   : > { %786 = vmatmul.mubr.msk.f32.gmra.mxu0 %vm216_vm1, %v179_v19  ;;  %810 = vmatmul.mubr.msk.f32.gmra.mxu1 %vm216_vm1, %v195_v20 }
  0x2c   : > { %788 = vmatprep.mubr.msk.f32.mxu0 %vm216_vm1, %v180_v21  ;;  %812 = vmatprep.mubr.msk.f32.mxu1 %vm216_vm1, %v196_v22 }
  0x2f   : > { %789 = vmatmul.mubr.msk.f32.gmra.mxu0 %vm216_vm1, %v181_v23  ;;  %813 = vmatmul.mubr.msk.f32.gmra.mxu1 %vm216_vm1, %v197_v24 }
  0x30   : > { %791 = vmatprep.mubr.msk.f32.mxu0 %vm216_vm1, %v182_v25  ;;  %815 = vmatprep.mubr.msk.f32.mxu1 %vm216_vm1, %v198_v26 }
  0x33   : > { %792 = vmatmul.mubr.msk.f32.gmra.mxu0 %vm216_vm1, %v183_v27  ;;  %816 = vmatmul.mubr.msk.f32.gmra.mxu1 %vm216_vm1, %v199_v28 }
  0x34   : > { %794 = vmatprep.mubr.msk.f32.mxu0 %vm216_vm1, %v184_v29  ;;  %818 = vmatprep.mubr.msk.f32.mxu1 %vm216_vm1, %v200_v30 }
  0x37   : > { %795 = vmatmul.mubr.msk.f32.gmra.mxu0 %vm216_vm1, %v185_v31  ;;  %819 = vmatmul.mubr.msk.f32.gmra.mxu1 %vm216_vm1, %v201_v32 }
  0x38   : > { %797 = vmatprep.mubr.msk.f32.mxu0 %vm216_vm1, %v186_v33  ;;  %821 = vmatprep.mubr.msk.f32.mxu1 %vm216_vm1, %v202_v34 }
  0x3b   : > { %798 = vmatmul.mubr.msk.f32.gmra.mxu0 %vm216_vm1, %v187_v35  ;;  %822 = vmatmul.mubr.msk.f32.gmra.mxu1 %vm216_vm1, %v203_v36 }
  0xdf   : > { %v778_v38 = vpop.f32.mrf.mxu0  ;;  %v802_v39 = vpop.f32.mrf.mxu1 }
  0xe0   : > { %v389_v40 = vadd.f32 %v778_v38, %v1097_v37  ;;  %v469_v41 = vadd.f32 %v802_v39, %v1097_v37 }
  0xe1   : > { %v383_v42 = vpop.f32.mrf.mxu0  ;;  %v463_v43 = vpop.f32.mrf.mxu1 }
  0xe2   : > { %v543_v44 = vmax.f32 %v389_v40, 0.0  ;;  %v559_v45 = vmax.f32 %v469_v41, 0.0  ;;  %v384_v46 = vadd.f32 %v1097_v37, %v383_v42  ;;  %v464_v47 = vadd.f32 %v1097_v37, %v463_v43 }
  0xe3   : > { %v781_v48 = vpop.f32.mrf.mxu0  ;;  %v805_v49 = vpop.f32.mrf.mxu1 }
  0xe4   : > { %575 = vst [vmem:[%s1105_s25 + $0x8] sm:$0xff] %v543_v44  ;;  %591 = vst [vmem:[%s1105_s25 + $0x88] sm:$0xff] %v559_v45  ;;  %v542_v50 = vmax.f32 %v384_v46, 0.0  ;;  %v558_v51 = vmax.f32 %v464_v47, 0.0  ;;  %v399_v52 = vadd.f32 %v781_v48, %v1097_v37  ;;  %v479_v53 = vadd.f32 %v805_v49, %v1097_v37 }
  0xe5   : > { %v393_v54 = vpop.f32.mrf.mxu0  ;;  %v473_v55 = vpop.f32.mrf.mxu1 }
  0xe6   : > { %574 = vst [vmem:[%s1105_s25] sm:$0xff] %v542_v50  ;;  %590 = vst [vmem:[%s1105_s25 + $0x80] sm:$0xff] %v558_v51  ;;  %v545_v56 = vmax.f32 %v399_v52, 0.0  ;;  %v561_v57 = vmax.f32 %v479_v53, 0.0  ;;  %v394_v58 = vadd.f32 %v1097_v37, %v393_v54  ;;  %v474_v59 = vadd.f32 %v1097_v37, %v473_v55 }
  0xe7   : > { %v784_v60 = vpop.f32.mrf.mxu0  ;;  %v808_v61 = vpop.f32.mrf.mxu1 }
  0xe8   : > { %577 = vst [vmem:[%s1105_s25 + $0x18] sm:$0xff] %v545_v56  ;;  %593 = vst [vmem:[%s1105_s25 + $0x98] sm:$0xff] %v561_v57  ;;  %v544_v62 = vmax.f32 %v394_v58, 0.0  ;;  %v560_v63 = vmax.f32 %v474_v59, 0.0  ;;  %v409_v0 = vadd.f32 %v784_v60, %v1097_v37  ;;  %v489_v1 = vadd.f32 %v808_v61, %v1097_v37 }
  0xe9   : > { %v403_v2 = vpop.f32.mrf.mxu0  ;;  %v483_v3 = vpop.f32.mrf.mxu1 }
  0xea   : > { %576 = vst [vmem:[%s1105_s25 + $0x10] sm:$0xff] %v544_v62  ;;  %592 = vst [vmem:[%s1105_s25 + $0x90] sm:$0xff] %v560_v63  ;;  %v547_v4 = vmax.f32 %v409_v0, 0.0  ;;  %v563_v5 = vmax.f32 %v489_v1, 0.0  ;;  %v404_v6 = vadd.f32 %v1097_v37, %v403_v2  ;;  %v484_v7 = vadd.f32 %v1097_v37, %v483_v3 }
  0xeb   : > { %v787_v8 = vpop.f32.mrf.mxu0  ;;  %v811_v9 = vpop.f32.mrf.mxu1 }
  0xec   : > { %579 = vst [vmem:[%s1105_s25 + $0x28] sm:$0xff] %v547_v4  ;;  %595 = vst [vmem:[%s1105_s25 + $0xa8] sm:$0xff] %v563_v5  ;;  %v546_v10 = vmax.f32 %v404_v6, 0.0  ;;  %v562_v11 = vmax.f32 %v484_v7, 0.0  ;;  %v419_v12 = vadd.f32 %v787_v8, %v1097_v37  ;;  %v499_v13 = vadd.f32 %v811_v9, %v1097_v37 }
  0xed   : > { %v413_v14 = vpop.f32.mrf.mxu0  ;;  %v493_v15 = vpop.f32.mrf.mxu1 }
  0xee   : > { %578 = vst [vmem:[%s1105_s25 + $0x20] sm:$0xff] %v546_v10  ;;  %594 = vst [vmem:[%s1105_s25 + $0xa0] sm:$0xff] %v562_v11  ;;  %v549_v16 = vmax.f32 %v419_v12, 0.0  ;;  %v565_v17 = vmax.f32 %v499_v13, 0.0  ;;  %v414_v18 = vadd.f32 %v1097_v37, %v413_v14  ;;  %v494_v19 = vadd.f32 %v1097_v37, %v493_v15 }
  0xef   : > { %v790_v20 = vpop.f32.mrf.mxu0  ;;  %v814_v21 = vpop.f32.mrf.mxu1 }
  0xf0   : > { %581 = vst [vmem:[%s1105_s25 + $0x38] sm:$0xff] %v549_v16  ;;  %597 = vst [vmem:[%s1105_s25 + $0xb8] sm:$0xff] %v565_v17  ;;  %v548_v22 = vmax.f32 %v414_v18, 0.0  ;;  %v564_v23 = vmax.f32 %v494_v19, 0.0  ;;  %v429_v24 = vadd.f32 %v790_v20, %v1097_v37  ;;  %v509_v25 = vadd.f32 %v814_v21, %v1097_v37 }
  0xf1   : > { %v423_v26 = vpop.f32.mrf.mxu0  ;;  %v503_v27 = vpop.f32.mrf.mxu1 }
  0xf2   : > { %580 = vst [vmem:[%s1105_s25 + $0x30] sm:$0xff] %v548_v22  ;;  %596 = vst [vmem:[%s1105_s25 + $0xb0] sm:$0xff] %v564_v23  ;;  %v551_v28 = vmax.f32 %v429_v24, 0.0  ;;  %v567_v29 = vmax.f32 %v509_v25, 0.0  ;;  %v424_v30 = vadd.f32 %v1097_v37, %v423_v26  ;;  %v504_v31 = vadd.f32 %v1097_v37, %v503_v27 }
  0xf3   : > { %v793_v32 = vpop.f32.mrf.mxu0  ;;  %v817_v33 = vpop.f32.mrf.mxu1 }
  0xf4   : > { %583 = vst [vmem:[%s1105_s25 + $0x48] sm:$0xff] %v551_v28  ;;  %599 = vst [vmem:[%s1105_s25 + $0xc8] sm:$0xff] %v567_v29  ;;  %v550_v34 = vmax.f32 %v424_v30, 0.0  ;;  %v566_v35 = vmax.f32 %v504_v31, 0.0  ;;  %v439_v36 = vadd.f32 %v793_v32, %v1097_v37  ;;  %v519_v38 = vadd.f32 %v817_v33, %v1097_v37 }
  0xf5   : > { %v433_v39 = vpop.f32.mrf.mxu0  ;;  %v513_v40 = vpop.f32.mrf.mxu1 }
  0xf6   : > { %582 = vst [vmem:[%s1105_s25 + $0x40] sm:$0xff] %v550_v34  ;;  %598 = vst [vmem:[%s1105_s25 + $0xc0] sm:$0xff] %v566_v35  ;;  %v553_v41 = vmax.f32 %v439_v36, 0.0  ;;  %v569_v42 = vmax.f32 %v519_v38, 0.0  ;;  %v434_v43 = vadd.f32 %v1097_v37, %v433_v39  ;;  %v514_v44 = vadd.f32 %v1097_v37, %v513_v40 }
  0xf7   : > { %v796_v45 = vpop.f32.mrf.mxu0  ;;  %v820_v46 = vpop.f32.mrf.mxu1 }
  0xf8   : > { %585 = vst [vmem:[%s1105_s25 + $0x58] sm:$0xff] %v553_v41  ;;  %601 = vst [vmem:[%s1105_s25 + $0xd8] sm:$0xff] %v569_v42  ;;  %v552_v47 = vmax.f32 %v434_v43, 0.0  ;;  %v568_v48 = vmax.f32 %v514_v44, 0.0  ;;  %v449_v49 = vadd.f32 %v796_v45, %v1097_v37  ;;  %v529_v50 = vadd.f32 %v820_v46, %v1097_v37 }
  0xf9   : > { %v443_v51 = vpop.f32.mrf.mxu0  ;;  %v523_v52 = vpop.f32.mrf.mxu1 }
  0xfa   : > { %584 = vst [vmem:[%s1105_s25 + $0x50] sm:$0xff] %v552_v47  ;;  %600 = vst [vmem:[%s1105_s25 + $0xd0] sm:$0xff] %v568_v48  ;;  %v555_v53 = vmax.f32 %v449_v49, 0.0  ;;  %v571_v54 = vmax.f32 %v529_v50, 0.0  ;;  %v444_v55 = vadd.f32 %v1097_v37, %v443_v51  ;;  %v524_v56 = vadd.f32 %v1097_v37, %v523_v52 }
  0xfb   : > { %v799_v57 = vpop.f32.mrf.mxu0  ;;  %v823_v58 = vpop.f32.mrf.mxu1 }
  0xfc   : > { %587 = vst [vmem:[%s1105_s25 + $0x68] sm:$0xff] %v555_v53  ;;  %603 = vst [vmem:[%s1105_s25 + $0xe8] sm:$0xff] %v571_v54  ;;  %v554_v59 = vmax.f32 %v444_v55, 0.0  ;;  %v570_v60 = vmax.f32 %v524_v56, 0.0  ;;  %v459_v61 = vadd.f32 %v799_v57, %v1097_v37  ;;  %v539_v62 = vadd.f32 %v823_v58, %v1097_v37 }
  0xfd   : > { %v453_v63 = vpop.f32.mrf.mxu0  ;;  %v533_v0 = vpop.f32.mrf.mxu1 }
  0xfe   : > { %586 = vst [vmem:[%s1105_s25 + $0x60] sm:$0xff] %v554_v59  ;;  %602 = vst [vmem:[%s1105_s25 + $0xe0] sm:$0xff] %v570_v60  ;;  %v557_v1 = vmax.f32 %v459_v61, 0.0  ;;  %v573_v2 = vmax.f32 %v539_v62, 0.0  ;;  %v454_v3 = vadd.f32 %v1097_v37, %v453_v63  ;;  %v534_v4 = vadd.f32 %v1097_v37, %v533_v0 }
 0x100   : > { %589 = vst [vmem:[%s1105_s25 + $0x78] sm:$0xff] %v557_v1  ;;  %605 = vst [vmem:[%s1105_s25 + $0xf8] sm:$0xff] %v573_v2  ;;  %v556_v5 = vmax.f32 %v454_v3, 0.0  ;;  %v572_v6 = vmax.f32 %v534_v4, 0.0 }
 0x102   : > { %588 = vst [vmem:[%s1105_s25 + $0x70] sm:$0xff] %v556_v5  ;;  %604 = vst [vmem:[%s1105_s25 + $0xf0] sm:$0xff] %v572_v6 }
 0x103   : > { %888 = shalt.err (!%p885_p3)
}
 0x104   : > { %s889_s8 = scalar_lea.hbm %s1168_s30, 4096  ;;  %s893_s11 = scalar_lea.hbm %s1221_s3, 8192 }
 0x105   : > { %p890_p4 = scmp.ne.s32.totalorder %s1168_s30, %s889_s8  ;;  %p894_p9 = scmp.lt.s32.totalorder %s1168_s30, %s1221_s3 }
 0x106   : > { %p895_p10 = scmp.lt.s32.totalorder %s893_s11, %s889_s8 }
 0x107   : > { %p891_p7 = pnand %p890_p4, %p998_p5 }
 0x108   : > { %p896_p11 = por %p895_p10, %p894_p9 }
 0x109   : > { %p892_p8 = pneg %p891_p7 }
 0x10b   : > { %p897_p12 = pnand %p896_p11, %p892_p8 }
 0x10d   : > { %900 = shalt.err (!%p897_p12)
}
 0x10e   : > { %s938_s20 = smov 128   ;;  %s939_s24 = smov 8  }
 0x10f   : > { %834 = dma.vmem_to_hbm [thread:$0]  (%p998_p5), %s1170_s27, 4096, %s1168_s30, %s1178_s16, %s938_s20, %s938_s20, %s939_s24  }
 0x110 PF: > { %p840_p13 = scmp.ge.s32.totalorder %s935_s15, 2  ;;  %s635_s25 = sand.u32 1, %s923_s12  }
 0x111   : > { %s636_s26 = scalar_lea.sflag [#allocation3], %s635_s25 }
 0x112   : > { %p837_p0 = pnand %p840_p13, %p1002_p6 }
 0x114   : > { %p838_p1 = pneg %p837_p0 }
 0x116   : > { %918 = dma.done.wait (%p838_p1), %s636_s26, 4096  }
 0x117   : > { %920 = vsyncadd (%p838_p1), %s636_s26, 4294963200  ;;  %p13_p2 = scmp.ge.s32.totalorder %s985_s18, 4   ;;  %s1224_s12 = smov %s927_s13 }
 0x118   : > { %s1225_s13 = smov %s931_s14  ;;  %s1226_s14 = smov %s996_s21 }
 0x119   : > { %s1227_s15 = smov %s985_s18  ;;  %15 = sbr.rel (!%p13_p2) target bundleno = 3 (0x3), region = 67 }
 0x11e   :  { %641 = vsyncpa [#allocation3], 1 }
 0x11f   :  { %643 = vsyncpa [#allocation3 + $0x1], 1 }

</bundles_post_ra>
